<compile_context>
chip_gen: v5e
topology: v5e:2x2
jax: 0.10.0
libtpu: 0.0.40
codegen_flags: <defaults>
</compile_context>

<pallas_src>
import jax
import jax.numpy as jnp
from jax import lax
from jax.experimental import pallas as pl
from jax.experimental.pallas import tpu as pltpu


_LANES = 128  # TPU vreg lane width


def _round_up(a: int, b: int) -> int:
    return ((a + b - 1) // b) * b


def _linear_kernel(x_ref, w_ref, b_ref, o_ref):
    # x_ref: [tm, n_hid]        (bf16)
    # w_ref: [n_class_p, n_hid] (bf16, resident across the row grid)
    # b_ref: [1, n_class_p]     (f32)
    # o_ref: [tm, n_class_p]    (f32, lane-dense)
    #
    # Contract on the last dim of BOTH operands -> no transpose needed.
    acc = lax.dot_general(
        x_ref[...],
        w_ref[...],
        dimension_numbers=(((1,), (1,)), ((), ())),
        preferred_element_type=jnp.float32,
    )
    o_ref[...] = (acc + b_ref[...]).astype(o_ref.dtype)


def hgnn_classifier_forward(
    x, weight, bias, *, block_rows: int = 256, compute_dtype=jnp.bfloat16
):
    """y = x @ weight.T + bias  (exact semantics of nn.Linear.forward).

    x:      [N, n_hid]
    weight: [n_class, n_hid]   (PyTorch layout)
    bias:   [n_class]
    returns [N, n_class] in float32.
    """
    n, n_hid = x.shape
    n_class, n_hid_w = weight.shape
    assert n_hid == n_hid_w

    # ---- wrapper-side padding / casting (plain JAX glue) -------------------
    # Lane-dense output width (multiple of 128).
    n_class_p = _round_up(n_class, _LANES)

    # Row tile: multiple of 16 sublanes (safe for bf16 packing), capped by
    # block_rows.  Pad N so the grid divides evenly.
    tm = min(block_rows, _round_up(n, 16))
    n_pad = _round_up(n, tm)

    x_c = x.astype(compute_dtype)
    if n_pad != n:
        x_c = jnp.pad(x_c, ((0, n_pad - n), (0, 0)))

    w_c = jnp.pad(weight.astype(compute_dtype), ((0, n_class_p - n_class), (0, 0)))
    b_c = jnp.pad(bias.astype(jnp.float32), (0, n_class_p - n_class)).reshape(
        1, n_class_p
    )

    grid = (n_pad // tm,)

    y_full = pl.pallas_call(
        _linear_kernel,
        out_shape=jax.ShapeDtypeStruct((n_pad, n_class_p), jnp.float32),
        grid_spec=pltpu.PrefetchScalarGridSpec(
            num_scalar_prefetch=0,
            grid=grid,
            in_specs=[
                # x: tiled over rows (pipelined)
                pl.BlockSpec((tm, n_hid), lambda i: (i, 0)),
                # weight: constant block index -> DMA'd once, VMEM-resident
                pl.BlockSpec((n_class_p, n_hid), lambda i: (0, 0)),
                # bias: constant block index -> VMEM-resident
                pl.BlockSpec((1, n_class_p), lambda i: (0, 0)),
            ],
            out_specs=pl.BlockSpec((tm, n_class_p), lambda i: (i, 0)),
        ),
        compiler_params=pltpu.CompilerParams(
            # Row tiles are independent -> parallel (megacore sharding on v7x).
            dimension_semantics=("parallel",),
        ),
    )(x_c, w_c, b_c)

    # Strip row padding and the lane padding of the class dimension.
    return y_full[:n, :n_class]


if __name__ == "__main__":
    # Small shapes consistent with the module: n_hid=32, n_class=8, batch N=16.
    n_hid, n_class, N = 32, 8, 16

    key = jax.random.PRNGKey(0)
    kx, kw, kb = jax.random.split(key, 3)

    # Deterministic init mirroring nn.Linear's uniform(-1/sqrt(fan_in), ...).
    bound = 1.0 / (n_hid ** 0.5)
    weight = jax.random.uniform(kw, (n_class, n_hid), jnp.float32, -bound, bound)
    bias = jax.random.uniform(kb, (n_class,), jnp.float32, -bound, bound)
    x = jax.random.normal(kx, (N, n_hid), jnp.float32)

    y = hgnn_classifier_forward(x, weight, bias)
    y = jax.block_until_ready(y)

    # Reference with the same bf16 input rounding (f32 accumulation), so the
    # only difference vs. the kernel is f32 summation order.
    x_r = x.astype(jnp.bfloat16).astype(jnp.float32)
    w_r = weight.astype(jnp.bfloat16).astype(jnp.float32)
    y_ref = x_r @ w_r.T + bias

    assert y.shape == (N, n_class)
    assert jnp.allclose(y, y_ref, atol=1e-4, rtol=1e-4)

    # Sanity check against the pure-f32 nn.Linear math (loose, bf16 inputs).
    y_f32 = x @ weight.T + bias
    assert jnp.allclose(y, y_f32, atol=3e-2, rtol=3e-2)

    print("KERNEL_OK")
</pallas_src>

<mosaic_0001>
module attributes {stable_mosaic.version = 11 : i64} {
  func.func @_linear_kernel(%arg0: i32, %arg1: memref<16x32xbf16, #tpu.memory_space<vmem>>, %arg2: memref<128x32xbf16, #tpu.memory_space<vmem>>, %arg3: memref<1x128xf32, #tpu.memory_space<vmem>>, %arg4: memref<16x128xf32, #tpu.memory_space<vmem>>) attributes {dimension_semantics = [#tpu.dimension_semantics<parallel>], iteration_bounds = array<i64: 1>, scalar_prefetch = 0 : i64, scratch_operands = 0 : i64, tpu.core_type = #tpu.core_type<tc>, window_params = [{transform_indices = @transform_0, window_bounds = array<i64: 16, 32>}, {pipeline_mode = #tpu.pipeline_mode<synchronous>, transform_indices = @transform_1, window_bounds = array<i64: 128, 32>}, {pipeline_mode = #tpu.pipeline_mode<synchronous>, transform_indices = @transform_2, window_bounds = array<i64: 1, 128>}, {transform_indices = @transform_3, window_bounds = array<i64: 16, 128>}]} {
    %c0 = arith.constant 0 : index
    %c0_0 = arith.constant 0 : index
    %0 = vector.load %arg1[%c0, %c0_0] : memref<16x32xbf16, #tpu.memory_space<vmem>>, vector<16x32xbf16>
    %c0_1 = arith.constant 0 : index
    %c0_2 = arith.constant 0 : index
    %1 = vector.load %arg2[%c0_1, %c0_2] : memref<128x32xbf16, #tpu.memory_space<vmem>>, vector<128x32xbf16>
    %cst = arith.constant dense<0.000000e+00> : vector<16x128xf32>
    %2 = tpu.matmul %0, %1, %cst {dimension_numbers = #tpu.dot_dimension_numbers<[1], [1], [0], [0], [0, 0, 1, 0], [], []>} : vector<16x32xbf16>, vector<128x32xbf16>, vector<16x128xf32> -> vector<16x128xf32>
    %c0_3 = arith.constant 0 : index
    %c0_4 = arith.constant 0 : index
    %3 = vector.load %arg3[%c0_3, %c0_4] : memref<1x128xf32, #tpu.memory_space<vmem>>, vector<1x128xf32>
    %4 = vector.broadcast %3 : vector<1x128xf32> to vector<16x128xf32>
    %5 = arith.addf %2, %4 : vector<16x128xf32>
    %c0_5 = arith.constant 0 : index
    %c0_6 = arith.constant 0 : index
    %6 = vector.load %arg4[%c0_5, %c0_6] : memref<16x128xf32, #tpu.memory_space<vmem>>, vector<16x128xf32>
    tpu.vector_store %arg4[%c0_5, %c0_6], %5 {strides = array<i32>} : memref<16x128xf32, #tpu.memory_space<vmem>>, vector<16x128xf32>,
    return
  }
  func.func @transform_0(%arg0: i32) -> (i32, i32) {
    %c0_i32 = arith.constant 0 : i32
    %c0_i32_0 = arith.constant 0 : i32
    return %arg0, %c0_i32 : i32, i32
  }
  func.func @transform_1(%arg0: i32) -> (i32, i32) {
    %c0_i32 = arith.constant 0 : i32
    %c0_i32_0 = arith.constant 0 : i32
    %c0_i32_1 = arith.constant 0 : i32
    return %c0_i32, %c0_i32_0 : i32, i32
  }
  func.func @transform_2(%arg0: i32) -> (i32, i32) {
    %c0_i32 = arith.constant 0 : i32
    %c0_i32_0 = arith.constant 0 : i32
    %c0_i32_1 = arith.constant 0 : i32
    return %c0_i32, %c0_i32_0 : i32, i32
  }
  func.func @transform_3(%arg0: i32) -> (i32, i32) {
    %c0_i32 = arith.constant 0 : i32
    %c0_i32_0 = arith.constant 0 : i32
    return %arg0, %c0_i32 : i32, i32
  }
}

</mosaic_0001>

<bundles_post_ra>
// kernel: tpu_custom_call.1
= control target key start
LH: loop header
LB: loop body
LE: loop exit
PB: predicated region body
PF: predicated region fallthrough
CT: control target
= control target key end

     0   :  { %vm82_vm0 = vcmask 261120   ;;  %s285_s0 = inlined_call_operand.vmem [shape: bf16[16,32], index: 0, kind: input, shape index: {}]   ;;  %s286_s1 = inlined_call_operand.vmem [shape: bf16[128,32], index: 1, kind: input, shape index: {}]   ;;  %s287_s2 = inlined_call_operand.vmem [shape: f32[1,128], index: 2, kind: input, shape index: {}]   ;;  %s288_s3 = inlined_call_operand.hbm [shape: f32[16,128], index: 3, kind: output, shape index: {}]  }
   0x1   :  { %v189_v0 = vld [vmem:[%s286_s1 + $0x38] sm:$0xff] }
   0x2   :  { %v108_v1 = vsel %vm82_vm0, %v189_v0, 0 }
   0x3   :  { %8 = vsyncpa [#allocation3], 0  ;;  %110 = vmatpush.bf16.xpose.msra.mxu0 %v108_v1  ;;  %v188_v2 = vld [vmem:[%s286_s1 + $0x30] sm:$0xff]  ;;  %v187_v4 = vld [vmem:[%s286_s1 + $0x28] sm:$0xff]  ;;  %s220_s5 = smov [#allocation2]   ;;  %s132_s8 = sshll.u32 %s288_s3, 4  ;;  %s133_s8 = int_to_ptr.hbm [resolvable:$true] %s132_s8 }
   0x4   :  { %v105_v3 = vsel %vm82_vm0, %v188_v2, 0  ;;  %v102_v5 = vsel %vm82_vm0, %v187_v4, 0  ;;  %v186_v6 = vld [vmem:[%s286_s1 + $0x20] sm:$0xff]  ;;  %v185_v8 = vld [vmem:[%s286_s1 + $0x18] sm:$0xff]  ;;  %v184_v10 = vld [vmem:[%s286_s1 + $0x10] sm:$0xff]  ;;  %s130_s6 = sshll.u32 %s220_s5, 4  ;;  %s131_s6 = int_to_ptr.vmem [resolvable:$true] %s130_s6 }
   0x5   :  { %v99_v7 = vsel %vm82_vm0, %v186_v6, 0  ;;  %v96_v9 = vsel %vm82_vm0, %v185_v8, 0  ;;  %v93_v11 = vsel %vm82_vm0, %v184_v10, 0  ;;  %v183_v12 = vld [vmem:[%s286_s1 + $0x8] sm:$0xff]  ;;  %v182_v14 = vld [vmem:[%s286_s1] sm:$0xff]  ;;  %s222_s9 = smov 8  }
   0x6   :  { %v90_v13 = vsel %vm82_vm0, %v183_v12, 0  ;;  %v87_v15 = vsel %vm82_vm0, %v182_v14, 0  ;;  %v181_v16 = vld [vmem:[%s285_s0] sm:$0xff]  ;;  %s221_s0 = smov 128  }
   0x7   :  { %v193_v17 = vld [vmem:[%s287_s2] ss:$0 sm:$0xff] }
   0xb   :  { %111 = vmatpush.bf16.xpose.msra.mxu0 %v105_v3 }
  0x13   :  { %112 = vmatpush.bf16.xpose.msra.mxu0 %v102_v5 }
  0x1b   :  { %113 = vmatpush.bf16.xpose.msra.mxu0 %v99_v7 }
  0x23   :  { %114 = vmatpush.bf16.xpose.msra.mxu0 %v96_v9 }
  0x2b   :  { %115 = vmatpush.bf16.xpose.msra.mxu0 %v93_v11 }
  0x33   :  { %116 = vmatpush.bf16.xpose.msra.mxu0 %v90_v13 }
  0x3b   :  { %117 = vmatpush.bf16.xpose.msra.mxu0 %v87_v15 }
  0x42   :  { %180 = vmatmul.msk.bf16.vlgmr.msra.gmra.mxu0 %vm82_vm0, %v181_v16 }
  0xbf   :  { %v119_v18 = vpop.f32.mrf.mxu0 }
  0xc0   :  { %v120_v19 = vadd.f32 %v193_v17, %v119_v18 }
  0xc2   :  { %124 = vst [vmem:[#allocation2] sm:$0xff] %v120_v19 }
  0xc7   :  { %v121_v20 = vpop.f32.mrf.mxu0 }
  0xc8   :  { %v122_v21 = vadd.f32 %v193_v17, %v121_v20 }
  0xca   :  { %125 = vst [vmem:[#allocation2 + $0x8] sm:$0xff] %v122_v21 }
  0xcb   :  { %138 = dma.vmem_to_hbm [thread:$0]  %s131_s6, 256, %s133_s8, [#allocation3], %s221_s0, %s221_s0, %s222_s9  }
  0xcc   :  { %218 = dma.done.wait [#allocation3], 256  }
  0xcd   :  { %219 = vsyncadd [#allocation3], 4294967040 }
  0xce   :  { %143 = vsyncpa [#allocation3], 1 }

</bundles_post_ra>
